<compile_context>
chip_gen: v6e
topology: v6e:2x2x1
jax: 0.10.0
libtpu: 0.0.40
codegen_flags: <defaults>
</compile_context>

<pallas_src>
import functools

import jax
import jax.numpy as jnp
from jax.experimental import pallas as pl
from jax.experimental.pallas import tpu as pltpu


# ----------------------------------------------------------------------------
# Pallas kernel: full residual attention block for ONE batch element.
# ----------------------------------------------------------------------------
def _res_attn_block_kernel(n_head,
                           x_ref,
                           ln1_w_ref, ln1_b_ref,
                           w_qkv_ref, b_qkv_ref,
                           wo_ref, bo_ref,
                           ln2_w_ref, ln2_b_ref,
                           w_fc_ref, b_fc_ref,
                           w_proj_ref, b_proj_ref,
                           o_ref):
    x = x_ref[0].astype(jnp.float32)                       # (L, D) f32
    L, D = x.shape
    Dh = D // n_head
    eps = 1e-5

    def layer_norm(v, w, b):                               # f32 math (matches fp32 LN)
        mu = jnp.mean(v, axis=-1, keepdims=True)
        var = jnp.mean(jnp.square(v - mu), axis=-1, keepdims=True)
        return (v - mu) * jax.lax.rsqrt(var + eps) * w + b

    # ---- attention branch: x + MHA(LN1(x)) --------------------------------
    x1 = layer_norm(x, ln1_w_ref[0], ln1_b_ref[0])
    # Fused QKV: one MXU launch, bf16 operands, f32 accumulation, bias add in f32.
    qkv = jnp.dot(x1.astype(jnp.bfloat16), w_qkv_ref[...],
                  preferred_element_type=jnp.float32) + b_qkv_ref[0]        # (L, 3D)
    q = qkv[:, 0 * D:1 * D]
    k = qkv[:, 1 * D:2 * D]
    v = qkv[:, 2 * D:3 * D]

    scale = 1.0 / (Dh ** 0.5)
    wo = wo_ref[...]                                       # (D, D) bf16, loaded once
    attn_acc = jnp.zeros((L, D), jnp.float32)
    # Static (unrolled) head loop. The output projection is folded per head, so no
    # concat along the lane axis is needed: sum_h (p_h @ v_h) @ W_o[h] == concat @ W_o.
    for h in range(n_head):
        sl = slice(h * Dh, (h + 1) * Dh)
        qh = q[:, sl].astype(jnp.bfloat16)
        kh = k[:, sl].astype(jnp.bfloat16)
        vh = v[:, sl].astype(jnp.bfloat16)
        s = jnp.dot(qh, kh.T, preferred_element_type=jnp.float32) * scale   # (L, L) f32
        s = s - jnp.max(s, axis=-1, keepdims=True)
        e = jnp.exp(s)
        p = e * pl.reciprocal(jnp.sum(e, axis=-1, keepdims=True), approx=True)
        oh = jnp.dot(p.astype(jnp.bfloat16), vh,
                     preferred_element_type=jnp.float32)                    # (L, Dh)
        attn_acc += jnp.dot(oh.astype(jnp.bfloat16), wo[sl, :],
                            preferred_element_type=jnp.float32)             # (L, D)
    x2 = x + attn_acc + bo_ref[0]

    # ---- MLP branch: x2 + c_proj(QuickGELU(c_fc(LN2(x2)))) -----------------
    x2n = layer_norm(x2, ln2_w_ref[0], ln2_b_ref[0])
    hid = jnp.dot(x2n.astype(jnp.bfloat16), w_fc_ref[...],
                  preferred_element_type=jnp.float32) + b_fc_ref[0]         # (L, 4D)
    hid = hid * jax.nn.sigmoid(1.702 * hid)                                 # QuickGELU (f32)
    mlp = jnp.dot(hid.astype(jnp.bfloat16), w_proj_ref[...],
                  preferred_element_type=jnp.float32) + b_proj_ref[0]       # (L, D)

    o_ref[0] = (x2 + mlp).astype(o_ref.dtype)


# ----------------------------------------------------------------------------
# Wrappers
# ----------------------------------------------------------------------------
_PARAM_ORDER = ("ln1_w", "ln1_b", "w_qkv", "b_qkv", "wo", "bo",
                "ln2_w", "ln2_b", "w_fc", "b_fc", "w_proj", "b_proj")
_BF16_WEIGHTS = ("w_qkv", "wo", "w_fc", "w_proj")


def _prepare_params(params):
    """Fuse QKV weights/biases and cast the big matrices to bf16 for the MXU."""
    p = dict(params)
    if "w_qkv" not in p:
        p["w_qkv"] = jnp.concatenate([p.pop("wq"), p.pop("wk"), p.pop("wv")], axis=1)
        p["b_qkv"] = jnp.concatenate([p.pop("bq"), p.pop("bk"), p.pop("bv")], axis=1)
    out = {}
    for name in _PARAM_ORDER:
        val = p[name]
        out[name] = (val.astype(jnp.bfloat16) if name in _BF16_WEIGHTS
                     else val.astype(jnp.float32))
    return out


def _vmem_limit_bytes(L, D, param_vals):
    """Budget = single-buffered weights + double-buffered I/O blocks + f32 working set."""
    weight_bytes = sum(int(v.size) * v.dtype.itemsize for v in param_vals)
    io_bytes = 2 * 2 * L * D * 4                               # x block + out block, 2-deep
    work_bytes = L * (3 * D + 8 * D + 4 * D + L) * 4           # qkv, hidden, acc, scores
    budget = 2 * (weight_bytes + io_bytes + work_bytes)        # 2x headroom
    return int(min(96 * 1024 * 1024, max(32 * 1024 * 1024, budget)))


def residual_attention_block_batch_first(x_nld, params, n_head):
    """Core Pallas entry point. x_nld: (N, L, D) -> (N, L, D). No HBM transposes."""
    N, L, D = x_nld.shape
    assert D % n_head == 0, "d_model must be divisible by n_head"
    p = _prepare_params(params)
    param_vals = [p[k] for k in _PARAM_ORDER]

    def const_spec(shape):
        # Weights never change across the batch grid: constant block index, single buffer.
        nd = len(shape)
        return pl.BlockSpec(shape, lambda n, _nd=nd: (0,) * _nd,
                            pipeline_mode=pl.Buffered(1))

    in_specs = [pl.BlockSpec((1, L, D), lambda n: (n, 0, 0))]
    in_specs += [const_spec(v.shape) for v in param_vals]

    return pl.pallas_call(
        functools.partial(_res_attn_block_kernel, n_head),
        out_shape=jax.ShapeDtypeStruct((N, L, D), x_nld.dtype),
        grid_spec=pltpu.PrefetchScalarGridSpec(
            num_scalar_prefetch=0,
            grid=(N,),
            in_specs=in_specs,
            out_specs=pl.BlockSpec((1, L, D), lambda n: (n, 0, 0)),
        ),
        compiler_params=pltpu.CompilerParams(
            dimension_semantics=("parallel",),
            vmem_limit_bytes=_vmem_limit_bytes(L, D, param_vals),
        ),
    )(x_nld, *param_vals)


def residual_attention_block(x_lnd, params, n_head):
    """Seq-first (L, N, D) convention of torch.nn.MultiheadAttention.

    NOTE: the two transposes below are a full HBM round trip of the activations;
    callers that already hold batch-first data should use
    residual_attention_block_batch_first directly.
    """
    out = residual_attention_block_batch_first(
        jnp.transpose(x_lnd, (1, 0, 2)), params, n_head)
    return jnp.transpose(out, (1, 0, 2))


# ----------------------------------------------------------------------------
# Deterministic parameter construction + pure-JAX reference (f32)
# ----------------------------------------------------------------------------
def make_params(key, d_model):
    D = d_model
    ks = jax.random.split(key, 10)
    s = 0.05
    return {
        "ln1_w": jnp.ones((1, D), jnp.float32),
        "ln1_b": jnp.zeros((1, D), jnp.float32),
        "wq": s * jax.random.normal(ks[0], (D, D), jnp.float32),
        "wk": s * jax.random.normal(ks[1], (D, D), jnp.float32),
        "wv": s * jax.random.normal(ks[2], (D, D), jnp.float32),
        "bq": s * jax.random.normal(ks[3], (1, D), jnp.float32),
        "bk": s * jax.random.normal(ks[4], (1, D), jnp.float32),
        "bv": s * jax.random.normal(ks[5], (1, D), jnp.float32),
        "wo": s * jax.random.normal(ks[6], (D, D), jnp.float32),
        "bo": jnp.zeros((1, D), jnp.float32),
        "ln2_w": jnp.ones((1, D), jnp.float32),
        "ln2_b": jnp.zeros((1, D), jnp.float32),
        "w_fc": s * jax.random.normal(ks[7], (D, 4 * D), jnp.float32),
        "b_fc": s * jax.random.normal(ks[8], (1, 4 * D), jnp.float32),
        "w_proj": s * jax.random.normal(ks[9], (4 * D, D), jnp.float32),
        "b_proj": jnp.zeros((1, D), jnp.float32),
    }


def reference_block(x_lnd, p, n_head):
    """Plain-JAX f32 reference mirroring the PyTorch forward (attn_mask=None)."""
    L, N, D = x_lnd.shape
    Dh = D // n_head
    x = jnp.transpose(x_lnd, (1, 0, 2)).astype(jnp.float32)   # (N, L, D)

    def ln(v, w, b):
        mu = v.mean(-1, keepdims=True)
        var = ((v - mu) ** 2).mean(-1, keepdims=True)
        return (v - mu) / jnp.sqrt(var + 1e-5) * w[0] + b[0]

    x1 = ln(x, p["ln1_w"], p["ln1_b"])
    q = x1 @ p["wq"] + p["bq"][0]
    k = x1 @ p["wk"] + p["bk"][0]
    v = x1 @ p["wv"] + p["bv"][0]
    q = q.reshape(N, L, n_head, Dh).transpose(0, 2, 1, 3)
    k = k.reshape(N, L, n_head, Dh).transpose(0, 2, 1, 3)
    v = v.reshape(N, L, n_head, Dh).transpose(0, 2, 1, 3)
    s = jnp.einsum("nhqd,nhkd->nhqk", q, k) / jnp.sqrt(Dh)
    a = jax.nn.softmax(s, axis=-1)
    o = jnp.einsum("nhqk,nhkd->nhqd", a, v).transpose(0, 2, 1, 3).reshape(N, L, D)
    o = o @ p["wo"] + p["bo"][0]
    x2 = x + o
    x2n = ln(x2, p["ln2_w"], p["ln2_b"])
    h = x2n @ p["w_fc"] + p["b_fc"][0]
    h = h * jax.nn.sigmoid(1.702 * h)
    out = x2 + (h @ p["w_proj"] + p["b_proj"][0])
    return jnp.transpose(out, (1, 0, 2))


# ----------------------------------------------------------------------------
if __name__ == "__main__":
    L, N, D, H = 8, 2, 32, 4        # seq=8, batch=2, d_model=32, n_head=4

    key = jax.random.PRNGKey(0)
    kx, kp = jax.random.split(key)
    x = jax.random.normal(kx, (L, N, D), jnp.float32)
    params = make_params(kp, D)

    out = residual_attention_block(x, params, H)
    out = jax.block_until_ready(out)

    ref = reference_block(x, params, H)
    assert out.shape == (L, N, D)
    # bf16 MXU operands (f32 accumulation) introduce ~1e-3-level error vs. the f32 ref.
    max_err = float(jnp.max(jnp.abs(out - ref)))
    assert jnp.allclose(out, ref, rtol=2e-2, atol=2e-2), max_err

    print("KERNEL_OK")
</pallas_src>

<mosaic_0001>
module attributes {stable_mosaic.version = 11 : i64} {
  func.func @_res_attn_block_kernel(%arg0: i32, %arg1: memref<1x8x32xf32, #tpu.memory_space<vmem>>, %arg2: memref<1x32xf32, #tpu.memory_space<vmem>>, %arg3: memref<1x32xf32, #tpu.memory_space<vmem>>, %arg4: memref<32x96xbf16, #tpu.memory_space<vmem>>, %arg5: memref<1x96xf32, #tpu.memory_space<vmem>>, %arg6: memref<32x32xbf16, #tpu.memory_space<vmem>>, %arg7: memref<1x32xf32, #tpu.memory_space<vmem>>, %arg8: memref<1x32xf32, #tpu.memory_space<vmem>>, %arg9: memref<1x32xf32, #tpu.memory_space<vmem>>, %arg10: memref<32x128xbf16, #tpu.memory_space<vmem>>, %arg11: memref<1x128xf32, #tpu.memory_space<vmem>>, %arg12: memref<128x32xbf16, #tpu.memory_space<vmem>>, %arg13: memref<1x32xf32, #tpu.memory_space<vmem>>, %arg14: memref<1x8x32xf32, #tpu.memory_space<vmem>>) attributes {dimension_semantics = [#tpu.dimension_semantics<parallel>], iteration_bounds = array<i64: 2>, scalar_prefetch = 0 : i64, scratch_operands = 0 : i64, tpu.core_type = #tpu.core_type<tc>, window_params = [{transform_indices = @transform_0, window_bounds = array<i64: 1, 8, 32>}, {pipeline_mode = #tpu.pipeline_mode<synchronous>, transform_indices = @transform_1, window_bounds = array<i64: 1, 32>}, {pipeline_mode = #tpu.pipeline_mode<synchronous>, transform_indices = @transform_2, window_bounds = array<i64: 1, 32>}, {pipeline_mode = #tpu.pipeline_mode<synchronous>, transform_indices = @transform_3, window_bounds = array<i64: 32, 96>}, {pipeline_mode = #tpu.pipeline_mode<synchronous>, transform_indices = @transform_4, window_bounds = array<i64: 1, 96>}, {pipeline_mode = #tpu.pipeline_mode<synchronous>, transform_indices = @transform_5, window_bounds = array<i64: 32, 32>}, {pipeline_mode = #tpu.pipeline_mode<synchronous>, transform_indices = @transform_6, window_bounds = array<i64: 1, 32>}, {pipeline_mode = #tpu.pipeline_mode<synchronous>, transform_indices = @transform_7, window_bounds = array<i64: 1, 32>}, {pipeline_mode = #tpu.pipeline_mode<synchronous>, transform_indices = @transform_8, window_bounds = array<i64: 1, 32>}, {pipeline_mode = #tpu.pipeline_mode<synchronous>, transform_indices = @transform_9, window_bounds = array<i64: 32, 128>}, {pipeline_mode = #tpu.pipeline_mode<synchronous>, transform_indices = @transform_10, window_bounds = array<i64: 1, 128>}, {pipeline_mode = #tpu.pipeline_mode<synchronous>, transform_indices = @transform_11, window_bounds = array<i64: 128, 32>}, {pipeline_mode = #tpu.pipeline_mode<synchronous>, transform_indices = @transform_12, window_bounds = array<i64: 1, 32>}, {transform_indices = @transform_13, window_bounds = array<i64: 1, 8, 32>}]} {
    %c0 = arith.constant 0 : index
    %c0_0 = arith.constant 0 : index
    %c0_1 = arith.constant 0 : index
    %0 = vector.load %arg1[%c0, %c0_0, %c0_1] : memref<1x8x32xf32, #tpu.memory_space<vmem>>, vector<1x8x32xf32>
    %1 = vector.shape_cast %0 : vector<1x8x32xf32> to vector<8x32xf32>
    %c0_2 = arith.constant 0 : index
    %c0_3 = arith.constant 0 : index
    %2 = vector.load %arg2[%c0_2, %c0_3] : memref<1x32xf32, #tpu.memory_space<vmem>>, vector<1x32xf32>
    %3 = vector.shape_cast %2 : vector<1x32xf32> to vector<32xf32>
    %c0_4 = arith.constant 0 : index
    %c0_5 = arith.constant 0 : index
    %4 = vector.load %arg3[%c0_4, %c0_5] : memref<1x32xf32, #tpu.memory_space<vmem>>, vector<1x32xf32>
    %5 = vector.shape_cast %4 : vector<1x32xf32> to vector<32xf32>
    %cst = arith.constant dense<0.000000e+00> : vector<8xf32>
    %6 = vector.multi_reduction <add>, %1, %cst [1] : vector<8x32xf32> to vector<8xf32>
    %7 = vector.shape_cast %6 : vector<8xf32> to vector<8x1xf32>
    %cst_6 = arith.constant 3.200000e+01 : f32
    %8 = vector.broadcast %cst_6 : f32 to vector<8x1xf32>
    %9 = arith.divf %7, %8 : vector<8x1xf32>
    %10 = vector.broadcast %9 : vector<8x1xf32> to vector<8x32xf32>
    %11 = arith.subf %1, %10 : vector<8x32xf32>
    %12 = arith.mulf %11, %11 : vector<8x32xf32>
    %cst_7 = arith.constant dense<0.000000e+00> : vector<8xf32>
    %13 = vector.multi_reduction <add>, %12, %cst_7 [1] : vector<8x32xf32> to vector<8xf32>
    %14 = vector.shape_cast %13 : vector<8xf32> to vector<8x1xf32>
    %cst_8 = arith.constant 3.200000e+01 : f32
    %15 = vector.broadcast %cst_8 : f32 to vector<8x1xf32>
    %16 = arith.divf %14, %15 : vector<8x1xf32>
    %17 = vector.broadcast %9 : vector<8x1xf32> to vector<8x32xf32>
    %18 = arith.subf %1, %17 : vector<8x32xf32>
    %cst_9 = arith.constant 9.99999974E-6 : f32
    %19 = vector.broadcast %cst_9 : f32 to vector<8x1xf32>
    %20 = arith.addf %16, %19 : vector<8x1xf32>
    %21 = math.rsqrt %20 : vector<8x1xf32>
    %22 = vector.broadcast %21 : vector<8x1xf32> to vector<8x32xf32>
    %23 = arith.mulf %18, %22 : vector<8x32xf32>
    %24 = vector.shape_cast %3 : vector<32xf32> to vector<1x32xf32>
    %25 = vector.broadcast %24 : vector<1x32xf32> to vector<8x32xf32>
    %26 = arith.mulf %23, %25 : vector<8x32xf32>
    %27 = vector.shape_cast %5 : vector<32xf32> to vector<1x32xf32>
    %28 = vector.broadcast %27 : vector<1x32xf32> to vector<8x32xf32>
    %29 = arith.addf %26, %28 : vector<8x32xf32>
    %30 = arith.truncf %29 : vector<8x32xf32> to vector<8x32xbf16>
    %c0_10 = arith.constant 0 : index
    %c0_11 = arith.constant 0 : index
    %31 = vector.load %arg4[%c0_10, %c0_11] : memref<32x96xbf16, #tpu.memory_space<vmem>>, vector<32x96xbf16>
    %cst_12 = arith.constant dense<0.000000e+00> : vector<8x96xf32>
    %32 = tpu.matmul %30, %31, %cst_12 {dimension_numbers = #tpu.dot_dimension_numbers<[1], [0], [0], [1], [0, 0, 1, 1], [], []>} : vector<8x32xbf16>, vector<32x96xbf16>, vector<8x96xf32> -> vector<8x96xf32>
    %c0_13 = arith.constant 0 : index
    %c0_14 = arith.constant 0 : index
    %33 = vector.load %arg5[%c0_13, %c0_14] : memref<1x96xf32, #tpu.memory_space<vmem>>, vector<1x96xf32>
    %34 = vector.shape_cast %33 : vector<1x96xf32> to vector<96xf32>
    %35 = vector.shape_cast %34 : vector<96xf32> to vector<1x96xf32>
    %36 = vector.broadcast %35 : vector<1x96xf32> to vector<8x96xf32>
    %37 = arith.addf %32, %36 : vector<8x96xf32>
    %38 = vector.extract_strided_slice %37 {offsets = [0, 0], sizes = [8, 32], strides = [1, 1]} : vector<8x96xf32> to vector<8x32xf32>
    %39 = vector.extract_strided_slice %37 {offsets = [0, 32], sizes = [8, 32], strides = [1, 1]} : vector<8x96xf32> to vector<8x32xf32>
    %40 = vector.extract_strided_slice %37 {offsets = [0, 64], sizes = [8, 32], strides = [1, 1]} : vector<8x96xf32> to vector<8x32xf32>
    %c0_15 = arith.constant 0 : index
    %c0_16 = arith.constant 0 : index
    %41 = vector.load %arg6[%c0_15, %c0_16] : memref<32x32xbf16, #tpu.memory_space<vmem>>, vector<32x32xbf16>
    %cst_17 = arith.constant 0.000000e+00 : f32
    %42 = vector.broadcast %cst_17 : f32 to vector<8x32xf32>
    %43 = vector.extract_strided_slice %38 {offsets = [0, 0], sizes = [8, 8], strides = [1, 1]} : vector<8x32xf32> to vector<8x8xf32>
    %44 = arith.truncf %43 : vector<8x8xf32> to vector<8x8xbf16>
    %45 = vector.extract_strided_slice %39 {offsets = [0, 0], sizes = [8, 8], strides = [1, 1]} : vector<8x32xf32> to vector<8x8xf32>
    %46 = arith.truncf %45 : vector<8x8xf32> to vector<8x8xbf16>
    %47 = vector.extract_strided_slice %40 {offsets = [0, 0], sizes = [8, 8], strides = [1, 1]} : vector<8x32xf32> to vector<8x8xf32>
    %48 = arith.truncf %47 : vector<8x8xf32> to vector<8x8xbf16>
    %49 = tpu.transpose %46, [1, 0] : vector<8x8xbf16> -> vector<8x8xbf16>
    %cst_18 = arith.constant dense<0.000000e+00> : vector<8x8xf32>
    %50 = tpu.matmul %44, %49, %cst_18 {dimension_numbers = #tpu.dot_dimension_numbers<[1], [0], [0], [1], [0, 0, 1, 1], [], []>} : vector<8x8xbf16>, vector<8x8xbf16>, vector<8x8xf32> -> vector<8x8xf32>
    %cst_19 = arith.constant 0.353553385 : f32
    %51 = vector.broadcast %cst_19 : f32 to vector<8x8xf32>
    %52 = arith.mulf %50, %51 : vector<8x8xf32>
    %cst_20 = arith.constant dense<0xFF800000> : vector<8xf32>
    %53 = vector.multi_reduction <maximumf>, %52, %cst_20 [1] : vector<8x8xf32> to vector<8xf32>
    %54 = vector.shape_cast %53 : vector<8xf32> to vector<8x1xf32>
    %55 = vector.broadcast %54 : vector<8x1xf32> to vector<8x8xf32>
    %56 = arith.subf %52, %55 : vector<8x8xf32>
    %57 = math.exp %56 : vector<8x8xf32>
    %cst_21 = arith.constant dense<0.000000e+00> : vector<8xf32>
    %58 = vector.multi_reduction <add>, %57, %cst_21 [1] : vector<8x8xf32> to vector<8xf32>
    %59 = vector.shape_cast %58 : vector<8xf32> to vector<8x1xf32>
    %60 = tpu.reciprocal %59 {approx = true} : vector<8x1xf32> -> vector<8x1xf32>
    %61 = vector.broadcast %60 : vector<8x1xf32> to vector<8x8xf32>
    %62 = arith.mulf %57, %61 : vector<8x8xf32>
    %63 = arith.truncf %62 : vector<8x8xf32> to vector<8x8xbf16>
    %cst_22 = arith.constant dense<0.000000e+00> : vector<8x8xf32>
    %64 = tpu.matmul %63, %48, %cst_22 {dimension_numbers = #tpu.dot_dimension_numbers<[1], [0], [0], [1], [0, 0, 1, 1], [], []>} : vector<8x8xbf16>, vector<8x8xbf16>, vector<8x8xf32> -> vector<8x8xf32>
    %65 = arith.truncf %64 : vector<8x8xf32> to vector<8x8xbf16>
    %66 = vector.extract_strided_slice %41 {offsets = [0, 0], sizes = [8, 32], strides = [1, 1]} : vector<32x32xbf16> to vector<8x32xbf16>
    %cst_23 = arith.constant dense<0.000000e+00> : vector<8x32xf32>
    %67 = tpu.matmul %65, %66, %cst_23 {dimension_numbers = #tpu.dot_dimension_numbers<[1], [0], [0], [1], [0, 0, 1, 1], [], []>} : vector<8x8xbf16>, vector<8x32xbf16>, vector<8x32xf32> -> vector<8x32xf32>
    %68 = arith.addf %42, %67 : vector<8x32xf32>
    %69 = vector.extract_strided_slice %38 {offsets = [0, 8], sizes = [8, 8], strides = [1, 1]} : vector<8x32xf32> to vector<8x8xf32>
    %70 = arith.truncf %69 : vector<8x8xf32> to vector<8x8xbf16>
    %71 = vector.extract_strided_slice %39 {offsets = [0, 8], sizes = [8, 8], strides = [1, 1]} : vector<8x32xf32> to vector<8x8xf32>
    %72 = arith.truncf %71 : vector<8x8xf32> to vector<8x8xbf16>
    %73 = vector.extract_strided_slice %40 {offsets = [0, 8], sizes = [8, 8], strides = [1, 1]} : vector<8x32xf32> to vector<8x8xf32>
    %74 = arith.truncf %73 : vector<8x8xf32> to vector<8x8xbf16>
    %75 = tpu.transpose %72, [1, 0] : vector<8x8xbf16> -> vector<8x8xbf16>
    %cst_24 = arith.constant dense<0.000000e+00> : vector<8x8xf32>
    %76 = tpu.matmul %70, %75, %cst_24 {dimension_numbers = #tpu.dot_dimension_numbers<[1], [0], [0], [1], [0, 0, 1, 1], [], []>} : vector<8x8xbf16>, vector<8x8xbf16>, vector<8x8xf32> -> vector<8x8xf32>
    %cst_25 = arith.constant 0.353553385 : f32
    %77 = vector.broadcast %cst_25 : f32 to vector<8x8xf32>
    %78 = arith.mulf %76, %77 : vector<8x8xf32>
    %cst_26 = arith.constant dense<0xFF800000> : vector<8xf32>
    %79 = vector.multi_reduction <maximumf>, %78, %cst_26 [1] : vector<8x8xf32> to vector<8xf32>
    %80 = vector.shape_cast %79 : vector<8xf32> to vector<8x1xf32>
    %81 = vector.broadcast %80 : vector<8x1xf32> to vector<8x8xf32>
    %82 = arith.subf %78, %81 : vector<8x8xf32>
    %83 = math.exp %82 : vector<8x8xf32>
    %cst_27 = arith.constant dense<0.000000e+00> : vector<8xf32>
    %84 = vector.multi_reduction <add>, %83, %cst_27 [1] : vector<8x8xf32> to vector<8xf32>
    %85 = vector.shape_cast %84 : vector<8xf32> to vector<8x1xf32>
    %86 = tpu.reciprocal %85 {approx = true} : vector<8x1xf32> -> vector<8x1xf32>
    %87 = vector.broadcast %86 : vector<8x1xf32> to vector<8x8xf32>
    %88 = arith.mulf %83, %87 : vector<8x8xf32>
    %89 = arith.truncf %88 : vector<8x8xf32> to vector<8x8xbf16>
    %cst_28 = arith.constant dense<0.000000e+00> : vector<8x8xf32>
    %90 = tpu.matmul %89, %74, %cst_28 {dimension_numbers = #tpu.dot_dimension_numbers<[1], [0], [0], [1], [0, 0, 1, 1], [], []>} : vector<8x8xbf16>, vector<8x8xbf16>, vector<8x8xf32> -> vector<8x8xf32>
    %91 = arith.truncf %90 : vector<8x8xf32> to vector<8x8xbf16>
    %92 = vector.extract_strided_slice %41 {offsets = [8, 0], sizes = [8, 32], strides = [1, 1]} : vector<32x32xbf16> to vector<8x32xbf16>
    %cst_29 = arith.constant dense<0.000000e+00> : vector<8x32xf32>
    %93 = tpu.matmul %91, %92, %cst_29 {dimension_numbers = #tpu.dot_dimension_numbers<[1], [0], [0], [1], [0, 0, 1, 1], [], []>} : vector<8x8xbf16>, vector<8x32xbf16>, vector<8x32xf32> -> vector<8x32xf32>
    %94 = arith.addf %68, %93 : vector<8x32xf32>
    %95 = vector.extract_strided_slice %38 {offsets = [0, 16], sizes = [8, 8], strides = [1, 1]} : vector<8x32xf32> to vector<8x8xf32>
    %96 = arith.truncf %95 : vector<8x8xf32> to vector<8x8xbf16>
    %97 = vector.extract_strided_slice %39 {offsets = [0, 16], sizes = [8, 8], strides = [1, 1]} : vector<8x32xf32> to vector<8x8xf32>
    %98 = arith.truncf %97 : vector<8x8xf32> to vector<8x8xbf16>
    %99 = vector.extract_strided_slice %40 {offsets = [0, 16], sizes = [8, 8], strides = [1, 1]} : vector<8x32xf32> to vector<8x8xf32>
    %100 = arith.truncf %99 : vector<8x8xf32> to vector<8x8xbf16>
    %101 = tpu.transpose %98, [1, 0] : vector<8x8xbf16> -> vector<8x8xbf16>
    %cst_30 = arith.constant dense<0.000000e+00> : vector<8x8xf32>
    %102 = tpu.matmul %96, %101, %cst_30 {dimension_numbers = #tpu.dot_dimension_numbers<[1], [0], [0], [1], [0, 0, 1, 1], [], []>} : vector<8x8xbf16>, vector<8x8xbf16>, vector<8x8xf32> -> vector<8x8xf32>
    %cst_31 = arith.constant 0.353553385 : f32
    %103 = vector.broadcast %cst_31 : f32 to vector<8x8xf32>
    %104 = arith.mulf %102, %103 : vector<8x8xf32>
    %cst_32 = arith.constant dense<0xFF800000> : vector<8xf32>
    %105 = vector.multi_reduction <maximumf>, %104, %cst_32 [1] : vector<8x8xf32> to vector<8xf32>
    %106 = vector.shape_cast %105 : vector<8xf32> to vector<8x1xf32>
    %107 = vector.broadcast %106 : vector<8x1xf32> to vector<8x8xf32>
    %108 = arith.subf %104, %107 : vector<8x8xf32>
    %109 = math.exp %108 : vector<8x8xf32>
    %cst_33 = arith.constant dense<0.000000e+00> : vector<8xf32>
    %110 = vector.multi_reduction <add>, %109, %cst_33 [1] : vector<8x8xf32> to vector<8xf32>
    %111 = vector.shape_cast %110 : vector<8xf32> to vector<8x1xf32>
    %112 = tpu.reciprocal %111 {approx = true} : vector<8x1xf32> -> vector<8x1xf32>
    %113 = vector.broadcast %112 : vector<8x1xf32> to vector<8x8xf32>
    %114 = arith.mulf %109, %113 : vector<8x8xf32>
    %115 = arith.truncf %114 : vector<8x8xf32> to vector<8x8xbf16>
    %cst_34 = arith.constant dense<0.000000e+00> : vector<8x8xf32>
    %116 = tpu.matmul %115, %100, %cst_34 {dimension_numbers = #tpu.dot_dimension_numbers<[1], [0], [0], [1], [0, 0, 1, 1], [], []>} : vector<8x8xbf16>, vector<8x8xbf16>, vector<8x8xf32> -> vector<8x8xf32>
    %117 = arith.truncf %116 : vector<8x8xf32> to vector<8x8xbf16>
    %118 = vector.extract_strided_slice %41 {offsets = [16, 0], sizes = [8, 32], strides = [1, 1]} : vector<32x32xbf16> to vector<8x32xbf16>
    %cst_35 = arith.constant dense<0.000000e+00> : vector<8x32xf32>
    %119 = tpu.matmul %117, %118, %cst_35 {dimension_numbers = #tpu.dot_dimension_numbers<[1], [0], [0], [1], [0, 0, 1, 1], [], []>} : vector<8x8xbf16>, vector<8x32xbf16>, vector<8x32xf32> -> vector<8x32xf32>
    %120 = arith.addf %94, %119 : vector<8x32xf32>
    %121 = vector.extract_strided_slice %38 {offsets = [0, 24], sizes = [8, 8], strides = [1, 1]} : vector<8x32xf32> to vector<8x8xf32>
    %122 = arith.truncf %121 : vector<8x8xf32> to vector<8x8xbf16>
    %123 = vector.extract_strided_slice %39 {offsets = [0, 24], sizes = [8, 8], strides = [1, 1]} : vector<8x32xf32> to vector<8x8xf32>
    %124 = arith.truncf %123 : vector<8x8xf32> to vector<8x8xbf16>
    %125 = vector.extract_strided_slice %40 {offsets = [0, 24], sizes = [8, 8], strides = [1, 1]} : vector<8x32xf32> to vector<8x8xf32>
    %126 = arith.truncf %125 : vector<8x8xf32> to vector<8x8xbf16>
    %127 = tpu.transpose %124, [1, 0] : vector<8x8xbf16> -> vector<8x8xbf16>
    %cst_36 = arith.constant dense<0.000000e+00> : vector<8x8xf32>
    %128 = tpu.matmul %122, %127, %cst_36 {dimension_numbers = #tpu.dot_dimension_numbers<[1], [0], [0], [1], [0, 0, 1, 1], [], []>} : vector<8x8xbf16>, vector<8x8xbf16>, vector<8x8xf32> -> vector<8x8xf32>
    %cst_37 = arith.constant 0.353553385 : f32
    %129 = vector.broadcast %cst_37 : f32 to vector<8x8xf32>
    %130 = arith.mulf %128, %129 : vector<8x8xf32>
    %cst_38 = arith.constant dense<0xFF800000> : vector<8xf32>
    %131 = vector.multi_reduction <maximumf>, %130, %cst_38 [1] : vector<8x8xf32> to vector<8xf32>
    %132 = vector.shape_cast %131 : vector<8xf32> to vector<8x1xf32>
    %133 = vector.broadcast %132 : vector<8x1xf32> to vector<8x8xf32>
    %134 = arith.subf %130, %133 : vector<8x8xf32>
    %135 = math.exp %134 : vector<8x8xf32>
    %cst_39 = arith.constant dense<0.000000e+00> : vector<8xf32>
    %136 = vector.multi_reduction <add>, %135, %cst_39 [1] : vector<8x8xf32> to vector<8xf32>
    %137 = vector.shape_cast %136 : vector<8xf32> to vector<8x1xf32>
    %138 = tpu.reciprocal %137 {approx = true} : vector<8x1xf32> -> vector<8x1xf32>
    %139 = vector.broadcast %138 : vector<8x1xf32> to vector<8x8xf32>
    %140 = arith.mulf %135, %139 : vector<8x8xf32>
    %141 = arith.truncf %140 : vector<8x8xf32> to vector<8x8xbf16>
    %cst_40 = arith.constant dense<0.000000e+00> : vector<8x8xf32>
    %142 = tpu.matmul %141, %126, %cst_40 {dimension_numbers = #tpu.dot_dimension_numbers<[1], [0], [0], [1], [0, 0, 1, 1], [], []>} : vector<8x8xbf16>, vector<8x8xbf16>, vector<8x8xf32> -> vector<8x8xf32>
    %143 = arith.truncf %142 : vector<8x8xf32> to vector<8x8xbf16>
    %144 = vector.extract_strided_slice %41 {offsets = [24, 0], sizes = [8, 32], strides = [1, 1]} : vector<32x32xbf16> to vector<8x32xbf16>
    %cst_41 = arith.constant dense<0.000000e+00> : vector<8x32xf32>
    %145 = tpu.matmul %143, %144, %cst_41 {dimension_numbers = #tpu.dot_dimension_numbers<[1], [0], [0], [1], [0, 0, 1, 1], [], []>} : vector<8x8xbf16>, vector<8x32xbf16>, vector<8x32xf32> -> vector<8x32xf32>
    %146 = arith.addf %120, %145 : vector<8x32xf32>
    %147 = arith.addf %1, %146 : vector<8x32xf32>
    %c0_42 = arith.constant 0 : index
    %c0_43 = arith.constant 0 : index
    %148 = vector.load %arg7[%c0_42, %c0_43] : memref<1x32xf32, #tpu.memory_space<vmem>>, vector<1x32xf32>
    %149 = vector.shape_cast %148 : vector<1x32xf32> to vector<32xf32>
    %150 = vector.shape_cast %149 : vector<32xf32> to vector<1x32xf32>
    %151 = vector.broadcast %150 : vector<1x32xf32> to vector<8x32xf32>
    %152 = arith.addf %147, %151 : vector<8x32xf32>
    %c0_44 = arith.constant 0 : index
    %c0_45 = arith.constant 0 : index
    %153 = vector.load %arg8[%c0_44, %c0_45] : memref<1x32xf32, #tpu.memory_space<vmem>>, vector<1x32xf32>
    %154 = vector.shape_cast %153 : vector<1x32xf32> to vector<32xf32>
    %c0_46 = arith.constant 0 : index
    %c0_47 = arith.constant 0 : index
    %155 = vector.load %arg9[%c0_46, %c0_47] : memref<1x32xf32, #tpu.memory_space<vmem>>, vector<1x32xf32>
    %156 = vector.shape_cast %155 : vector<1x32xf32> to vector<32xf32>
    %cst_48 = arith.constant dense<0.000000e+00> : vector<8xf32>
    %157 = vector.multi_reduction <add>, %152, %cst_48 [1] : vector<8x32xf32> to vector<8xf32>
    %158 = vector.shape_cast %157 : vector<8xf32> to vector<8x1xf32>
    %cst_49 = arith.constant 3.200000e+01 : f32
    %159 = vector.broadcast %cst_49 : f32 to vector<8x1xf32>
    %160 = arith.divf %158, %159 : vector<8x1xf32>
    %161 = vector.broadcast %160 : vector<8x1xf32> to vector<8x32xf32>
    %162 = arith.subf %152, %161 : vector<8x32xf32>
    %163 = arith.mulf %162, %162 : vector<8x32xf32>
    %cst_50 = arith.constant dense<0.000000e+00> : vector<8xf32>
    %164 = vector.multi_reduction <add>, %163, %cst_50 [1] : vector<8x32xf32> to vector<8xf32>
    %165 = vector.shape_cast %164 : vector<8xf32> to vector<8x1xf32>
    %cst_51 = arith.constant 3.200000e+01 : f32
    %166 = vector.broadcast %cst_51 : f32 to vector<8x1xf32>
    %167 = arith.divf %165, %166 : vector<8x1xf32>
    %168 = vector.broadcast %160 : vector<8x1xf32> to vector<8x32xf32>
    %169 = arith.subf %152, %168 : vector<8x32xf32>
    %cst_52 = arith.constant 9.99999974E-6 : f32
    %170 = vector.broadcast %cst_52 : f32 to vector<8x1xf32>
    %171 = arith.addf %167, %170 : vector<8x1xf32>
    %172 = math.rsqrt %171 : vector<8x1xf32>
    %173 = vector.broadcast %172 : vector<8x1xf32> to vector<8x32xf32>
    %174 = arith.mulf %169, %173 : vector<8x32xf32>
    %175 = vector.shape_cast %154 : vector<32xf32> to vector<1x32xf32>
    %176 = vector.broadcast %175 : vector<1x32xf32> to vector<8x32xf32>
    %177 = arith.mulf %174, %176 : vector<8x32xf32>
    %178 = vector.shape_cast %156 : vector<32xf32> to vector<1x32xf32>
    %179 = vector.broadcast %178 : vector<1x32xf32> to vector<8x32xf32>
    %180 = arith.addf %177, %179 : vector<8x32xf32>
    %181 = arith.truncf %180 : vector<8x32xf32> to vector<8x32xbf16>
    %c0_53 = arith.constant 0 : index
    %c0_54 = arith.constant 0 : index
    %182 = vector.load %arg10[%c0_53, %c0_54] : memref<32x128xbf16, #tpu.memory_space<vmem>>, vector<32x128xbf16>
    %cst_55 = arith.constant dense<0.000000e+00> : vector<8x128xf32>
    %183 = tpu.matmul %181, %182, %cst_55 {dimension_numbers = #tpu.dot_dimension_numbers<[1], [0], [0], [1], [0, 0, 1, 1], [], []>} : vector<8x32xbf16>, vector<32x128xbf16>, vector<8x128xf32> -> vector<8x128xf32>
    %c0_56 = arith.constant 0 : index
    %c0_57 = arith.constant 0 : index
    %184 = vector.load %arg11[%c0_56, %c0_57] : memref<1x128xf32, #tpu.memory_space<vmem>>, vector<1x128xf32>
    %185 = vector.shape_cast %184 : vector<1x128xf32> to vector<128xf32>
    %186 = vector.shape_cast %185 : vector<128xf32> to vector<1x128xf32>
    %187 = vector.broadcast %186 : vector<1x128xf32> to vector<8x128xf32>
    %188 = arith.addf %183, %187 : vector<8x128xf32>
    %cst_58 = arith.constant 1.702000e+00 : f32
    %189 = vector.broadcast %cst_58 : f32 to vector<8x128xf32>
    %190 = arith.mulf %189, %188 : vector<8x128xf32>
    %191 = arith.negf %190 : vector<8x128xf32>
    %192 = math.exp %191 : vector<8x128xf32>
    %cst_59 = arith.constant 1.000000e+00 : f32
    %193 = vector.broadcast %cst_59 : f32 to vector<8x128xf32>
    %194 = arith.addf %193, %192 : vector<8x128xf32>
    %195 = arith.divf %193, %194 : vector<8x128xf32>
    %196 = arith.mulf %188, %195 : vector<8x128xf32>
    %197 = arith.truncf %196 : vector<8x128xf32> to vector<8x128xbf16>
    %c0_60 = arith.constant 0 : index
    %c0_61 = arith.constant 0 : index
    %198 = vector.load %arg12[%c0_60, %c0_61] : memref<128x32xbf16, #tpu.memory_space<vmem>>, vector<128x32xbf16>
    %cst_62 = arith.constant dense<0.000000e+00> : vector<8x32xf32>
    %199 = tpu.matmul %197, %198, %cst_62 {dimension_numbers = #tpu.dot_dimension_numbers<[1], [0], [0], [1], [0, 0, 1, 1], [], []>} : vector<8x128xbf16>, vector<128x32xbf16>, vector<8x32xf32> -> vector<8x32xf32>
    %c0_63 = arith.constant 0 : index
    %c0_64 = arith.constant 0 : index
    %200 = vector.load %arg13[%c0_63, %c0_64] : memref<1x32xf32, #tpu.memory_space<vmem>>, vector<1x32xf32>
    %201 = vector.shape_cast %200 : vector<1x32xf32> to vector<32xf32>
    %202 = vector.shape_cast %201 : vector<32xf32> to vector<1x32xf32>
    %203 = vector.broadcast %202 : vector<1x32xf32> to vector<8x32xf32>
    %204 = arith.addf %199, %203 : vector<8x32xf32>
    %205 = arith.addf %152, %204 : vector<8x32xf32>
    %c0_65 = arith.constant 0 : index
    %c0_66 = arith.constant 0 : index
    %c0_67 = arith.constant 0 : index
    %206 = vector.load %arg14[%c0_65, %c0_66, %c0_67] : memref<1x8x32xf32, #tpu.memory_space<vmem>>, vector<1x8x32xf32>
    %207 = vector.shape_cast %206 : vector<1x8x32xf32> to vector<8x32xf32>
    %208 = vector.shape_cast %205 : vector<8x32xf32> to vector<1x8x32xf32>
    tpu.vector_store %arg14[%c0_65, %c0_66, %c0_67], %208 {strides = array<i32>} : memref<1x8x32xf32, #tpu.memory_space<vmem>>, vector<1x8x32xf32>,
    return
  }
  func.func @transform_0(%arg0: i32) -> (i32, i32, i32) {
    %c0_i32 = arith.constant 0 : i32
    %c0_i32_0 = arith.constant 0 : i32
    %c0_i32_1 = arith.constant 0 : i32
    return %arg0, %c0_i32, %c0_i32_0 : i32, i32, i32
  }
  func.func @transform_1(%arg0: i32) -> (i32, i32) {
    %c0_i32 = arith.constant 0 : i32
    %c0_i32_0 = arith.constant 0 : i32
    %c0_i32_1 = arith.constant 0 : i32
    return %c0_i32, %c0_i32_0 : i32, i32
  }
  func.func @transform_2(%arg0: i32) -> (i32, i32) {
    %c0_i32 = arith.constant 0 : i32
    %c0_i32_0 = arith.constant 0 : i32
    %c0_i32_1 = arith.constant 0 : i32
    return %c0_i32, %c0_i32_0 : i32, i32
  }
  func.func @transform_3(%arg0: i32) -> (i32, i32) {
    %c0_i32 = arith.constant 0 : i32
    %c0_i32_0 = arith.constant 0 : i32
    %c0_i32_1 = arith.constant 0 : i32
    return %c0_i32, %c0_i32_0 : i32, i32
  }
  func.func @transform_4(%arg0: i32) -> (i32, i32) {
    %c0_i32 = arith.constant 0 : i32
    %c0_i32_0 = arith.constant 0 : i32
    %c0_i32_1 = arith.constant 0 : i32
    return %c0_i32, %c0_i32_0 : i32, i32
  }
  func.func @transform_5(%arg0: i32) -> (i32, i32) {
    %c0_i32 = arith.constant 0 : i32
    %c0_i32_0 = arith.constant 0 : i32
    %c0_i32_1 = arith.constant 0 : i32
    return %c0_i32, %c0_i32_0 : i32, i32
  }
  func.func @transform_6(%arg0: i32) -> (i32, i32) {
    %c0_i32 = arith.constant 0 : i32
    %c0_i32_0 = arith.constant 0 : i32
    %c0_i32_1 = arith.constant 0 : i32
    return %c0_i32, %c0_i32_0 : i32, i32
  }
  func.func @transform_7(%arg0: i32) -> (i32, i32) {
    %c0_i32 = arith.constant 0 : i32
    %c0_i32_0 = arith.constant 0 : i32
    %c0_i32_1 = arith.constant 0 : i32
    return %c0_i32, %c0_i32_0 : i32, i32
  }
  func.func @transform_8(%arg0: i32) -> (i32, i32) {
    %c0_i32 = arith.constant 0 : i32
    %c0_i32_0 = arith.constant 0 : i32
    %c0_i32_1 = arith.constant 0 : i32
    return %c0_i32, %c0_i32_0 : i32, i32
  }
  func.func @transform_9(%arg0: i32) -> (i32, i32) {
    %c0_i32 = arith.constant 0 : i32
    %c0_i32_0 = arith.constant 0 : i32
    %c0_i32_1 = arith.constant 0 : i32
    return %c0_i32, %c0_i32_0 : i32, i32
  }
  func.func @transform_10(%arg0: i32) -> (i32, i32) {
    %c0_i32 = arith.constant 0 : i32
    %c0_i32_0 = arith.constant 0 : i32
    %c0_i32_1 = arith.constant 0 : i32
    return %c0_i32, %c0_i32_0 : i32, i32
  }
  func.func @transform_11(%arg0: i32) -> (i32, i32) {
    %c0_i32 = arith.constant 0 : i32
    %c0_i32_0 = arith.constant 0 : i32
    %c0_i32_1 = arith.constant 0 : i32
    return %c0_i32, %c0_i32_0 : i32, i32
  }
  func.func @transform_12(%arg0: i32) -> (i32, i32) {
    %c0_i32 = arith.constant 0 : i32
    %c0_i32_0 = arith.constant 0 : i32
    %c0_i32_1 = arith.constant 0 : i32
    return %c0_i32, %c0_i32_0 : i32, i32
  }
  func.func @transform_13(%arg0: i32) -> (i32, i32, i32) {
    %c0_i32 = arith.constant 0 : i32
    %c0_i32_0 = arith.constant 0 : i32
    %c0_i32_1 = arith.constant 0 : i32
    return %arg0, %c0_i32, %c0_i32_0 : i32, i32, i32
  }
}

</mosaic_0001>

<bundles_post_ra>
// kernel: tpu_custom_call.1
= control target key start
LH: loop header
LB: loop body
LE: loop exit
PB: predicated region body
PF: predicated region fallthrough
CT: control target
= control target key end

     0   :  { %s2196_s0 = inlined_call_operand.vmem [shape: f32[2,8,32], index: 0, kind: input, shape index: {}]   ;;  %s2197_s1 = inlined_call_operand.vmem [shape: f32[1,32], index: 1, kind: input, shape index: {}]   ;;  %s2198_s2 = inlined_call_operand.vmem [shape: f32[1,32], index: 2, kind: input, shape index: {}]   ;;  %s2199_s3 = inlined_call_operand.vmem [shape: bf16[32,96], index: 3, kind: input, shape index: {}]   ;;  %s2200_s4 = inlined_call_operand.vmem [shape: f32[1,96], index: 4, kind: input, shape index: {}]   ;;  %s2201_s5 = inlined_call_operand.vmem [shape: bf16[32,32], index: 5, kind: input, shape index: {}]   ;;  %s2202_s6 = inlined_call_operand.vmem [shape: f32[1,32], index: 6, kind: input, shape index: {}]   ;;  %s2203_s7 = inlined_call_operand.vmem [shape: f32[1,32], index: 7, kind: input, shape index: {}]   ;;  %s2204_s8 = inlined_call_operand.vmem [shape: f32[1,32], index: 8, kind: input, shape index: {}]   ;;  %s2205_s9 = inlined_call_operand.vmem [shape: bf16[32,128], index: 9, kind: input, shape index: {}]   ;;  %s2206_s10 = inlined_call_operand.vmem [shape: f32[1,128], index: 10, kind: input, shape index: {}]   ;;  %s2207_s11 = inlined_call_operand.vmem [shape: bf16[128,32], index: 11, kind: input, shape index: {}]   ;;  %s2208_s12 = inlined_call_operand.vmem [shape: f32[1,32], index: 12, kind: input, shape index: {}]   ;;  %s2209_s13 = inlined_call_operand.hbm [shape: f32[2,8,32], index: 13, kind: output, shape index: {}]  }
   0x1   :  { %2210 = sst [smem:[#allocation5_spill]] %s2196_s0 }
   0x2   :  { %2211 = sst [smem:[#allocation6_spill]] %s2197_s1 }
   0x3   :  { %2212 = sst [smem:[#allocation7_spill]] %s2198_s2 }
   0x4   :  { %18 = vsyncpa [#allocation3], 0 }
   0x5   :  { %20 = vsyncpa [#allocation3 + $0x1], 0  ;;  %s1902_s25 = smov 0   ;;  %s1904_s26 = smov 0  }
   0x6   :  { %s1906_s27 = smov 0   ;;  %s1908_s28 = smov 0  }
   0x7 LB: > { %s1923_s29 = sadd.s32 4294967295, %s1816_s28   ;;  %s1476_s30 = sadd.s32 4294967294, %s1816_s28   ;;  %s1816_s28 = sphi %s1908_s28, %s2221_s28   ;;  %s1812_s27 = sphi %s1906_s27, %s2220_s27   ;;  %s1808_s26 = sphi %s1904_s26, %s2219_s26   ;;  %s1804_s25 = sphi %s1902_s25, %s2218_s25  }
   0x8   : > { %s1927_s14 = sadd.s32 1, %s1816_s28   ;;  %s311_s15 = sadd.s32 1, %s1812_s27 }
   0x9   : > { %s308_s16 = ssub.s32 %s1816_s28, %s1927_s14  ;;  %p321_p0 = scmp.ne.s32.totalorder %s1812_s27, %s1808_s26 }
   0xa   : > { %p309_p1 = scmp.eq.s32.totalorder %s308_s16, 0  ;;  %p322_p2 = scmp.eq.s32.totalorder %s1923_s29, 1 }
   0xb   : > { %p327_p3 = scmp.ne.s32.totalorder %s1808_s26, %s1804_s25  ;;  %p328_p4 = scmp.eq.s32.totalorder %s1476_s30, 1 }
   0xc   : > { %s1938_s17 = scalar_select %p309_p1, %s1812_s27, %s311_s15  }
   0xd   : > { %p1940_p5 = por %p322_p2, %p321_p0  ;;  %p1944_p6 = por %p328_p4, %p327_p3 }
   0xe   : > { %p1479_p7 = scmp.ge.s32.totalorder %s1816_s28, 1  ;;  %p389_p8 = scmp.lt.s32.totalorder %s1816_s28, 3 }
  0x10   : > { %p390_p9 = pnand %p1479_p7, %p389_p8 }
  0x11   : > { %p432_p10 = scmp.lt.s32.totalorder (!%p390_p9), %s1923_s29, 1  ;;  %s2215_s0 = sld [smem:[#allocation5_spill]] (!%p390_p9) }
  0x12   : > { %393 = sbr.rel (%p390_p9) target bundleno = 4061 (0xfdd), region = 72  ;;  %s2216_s1 = sld [smem:[#allocation6_spill]] (!%p390_p9) }
  0x13   : > { %s2217_s2 = sld [smem:[#allocation7_spill]] (!%p390_p9)  ;;  %s1820_s16 = smov (!%p390_p9), 64  }
  0x14   : > { %s1823_s22 = smov (!%p390_p9), 120   ;;  %s1824_s23 = smov (!%p390_p9), 56  }
  0x15   : > { %s1826_s30 = smov (!%p390_p9), 112   ;;  %s1827_s15 = smov (!%p390_p9), 48  }
  0x17   : > { %s433_s20 = scalar_select %p432_p10, %s1923_s29, 1  ;;  %vm440_vm0 = vcmask 261120   ;;  %v1720_v7 = vld [vmem:[%s2199_s3 + $0x8] sm:$0xff]   ;;  %v1818_v8 = vmov 0.0   ;;  %vm1819_vm1 = vmmov 0   ;;  %v1721_v9 = vld [vmem:[%s2199_s3] sm:$0xff]  }
  0x18   : > { %1560 = vmatprep.subr.bf16.mxu1 %v1818_v8  ;;  %1564 = vmatprep.mubr.msk.bf16.mxu1 %vm1819_vm1, %v1818_v8  ;;  %v1482_v14 = vld [vmem:[%s2216_s1] ss:$0 sm:$0xff]  ;;  %vm544_vm2 = vcmask 64512   ;;  %vm609_vm3 = vcmask 1043456  }
  0x19   : > { %s1481_s21 = sshll.u32 %s433_s20, 3  ;;  %1561 = vmatpush3.bf16.msra.mxu1 %v1720_v7  ;;  %1586 = vmatprep.subr.bf16.mxu0 %v1818_v8  ;;  %v1483_v16 = vld [vmem:[%s2217_s2] ss:$0 sm:$0xff]  ;;  %s1821_s20 = smov 96  }
  0x1a   : > { %s435_s24 = scalar_lea.vmem %s2215_s0, %s1481_s21  ;;  %1562 = vmatprep.subr.bf16.mxu1 %v1818_v8  ;;  %1588 = vmatprep.mubr.msk.bf16.mxu0 %vm1819_vm1, %v1818_v8  ;;  %v1484_v20 = vld [vmem:[%s2200_s4] ss:$0 sm:$0xff]  ;;  %s1822_s21 = smov 88  }
  0x1b   : > { %v1955_v0 = vld [vmem:[%s435_s24] sm:$0xff]  ;;  %s1825_s24 = smov 80  }
  0x1c   : > { %v441_v1 = vsel %vm440_vm0, %v1955_v0, 0.0  ;;  %v536_v7 = vld [vmem:[%s2201_s5] sm:$0xf] }
  0x1d   : > { %442 = vadd.xlane.f32.xlu0 %v441_v1  ;;  %1563 = vmatpush3.bf16.msra.mxu1 %v1721_v9 }
  0x1e   : > { %1568 = vmatprep.subr.bf16.mxu1 %v1818_v8 }
  0xa6   : > { %v443_v2 = vpop.xlane.xlu0 %442 }
  0xa7   : > { %v445_v3 = vmul.f32 0.03125, %v443_v2 }
  0xa9   : > { %v446_v4 = vsub.f32 %v1955_v0, %v445_v3  ;;  %v537_v3 = vld [vmem:[%s2201_s5 + $0x4] sm:$0xf] }
  0xab   : > { %v447_v5 = vmul.f32 %v446_v4, %v446_v4 }
  0xad   : > { %v448_v6 = vsel %vm440_vm0, %v447_v5, 0.0 }
  0xae   : > { %449 = vadd.xlane.f32.xlu0 %v448_v6 }
 0x137   : > { %v450_v10 = vpop.xlane.xlu0 %449 }
 0x138   : > { %v451_v11 = vmul.f32 0.03125, %v450_v10 }
 0x13a   : > { %v452_v12 = vadd.f32 1e-05, %v451_v11  ;;  %v816_v11 = vsel %vm609_vm3, %v536_v7, 0 }
 0x13c   : > { %1732 = vrsqrt.f32 %v452_v12 }
 0x149   : > { %v1733_v13 = vpop.eup %1732 }
 0x14a   : > { %v454_v15 = vmul.f32 %v1733_v13, %v446_v4  ;;  %v770_v4 = vsel %vm609_vm3, %v537_v3, 0 }
 0x14c   : > { %v461_v17 = vmul.f32 %v1482_v14, %v454_v15 }
 0x14e   : > { %v468_v18 = vadd.f32 %v1483_v16, %v461_v17 }
 0x150   : > { %v469_v19 = vpack.c.bf16 %v468_v18, %v468_v18 }
 0x152   : > { %1565 = vmatmul.mubr.msk.bf16.vlgmr.msra.gmra.mxu1 %vm440_vm0, %v469_v19 }
 0x153   : > { %1570 = vmatprep.mubr.msk.bf16.mxu1 %vm1819_vm1, %v1818_v8 }
 0x212   : > { %v530_v21 = vpop.f32.mrf.mxu1 }
 0x213   : > { %v531_v22 = vadd.f32 %v1484_v20, %v530_v21 }
 0x214   : > { %v1566_v23 = vpop.f32.mrf.mxu1 }
 0x215   : > { %v1987_v24 = vpack.c.bf16 %v531_v22, %v531_v22 }
 0x216   : > { %v533_v25 = vpop.f32.mrf.mxu1 }
 0x217   : > { %604 = vrot.lane.b32.xlu0 %v1987_v24, %s1820_s16  ;;  %542 = vrot.lane.b32.xlu1 %v1987_v24, %s1821_s20  ;;  %s1830_s16 = smov 40   ;;  %s1831_s20 = smov [#allocation2]  }
 0x218   : > { %v1567_v26 = vpop.f32.mrf.mxu1 }
 0x289   : > { %v543_v27 = vpop.permute.xlu1 %542  ;;  %v605_v29 = vpop.permute.xlu0 %604 }
 0x28a   : > { %v549_v28 = vsel %vm544_vm2, %v543_v27, 0  ;;  %v611_v30 = vsel %vm609_vm3, %v605_v29, 0 }
 0x28b   : > { %1569 = vmatpush3.bf16.xpose.msra.mxu1 %v549_v28 }
 0x28c   : > { %1574 = vmatprep.subr.bf16.mxu1 %v1818_v8 }
 0x292   : > { %1571 = vmatmul.mubr.msk.bf16.vlgmr.msra.gmra.mxu1 %vm544_vm2, %v1987_v24 }
 0x293   : > { %1575 = vmatpush3.bf16.msra.mxu1 %v611_v30  ;;  %1576 = vmatprep.mubr.msk.bf16.mxu1 %vm1819_vm1, %v1818_v8 }
 0x294   : > { %1580 = vmatprep.subr.bf16.mxu1 %v1818_v8 }
 0x352   : > { %v585_v31 = vpop.f32.mrf.mxu1 }
 0x353   : > { %v591_v32 = vmul.f32 0.35355338, %v585_v31 }
 0x354   : > { %v1572_v33 = vpop.f32.mrf.mxu1 }
 0x355   : > { %v592_v34 = vsel %vm544_vm2, %v591_v32, -inf }
 0x356   : > { %593 = vmax.xlane.f32.xlu1 %v592_v34  ;;  %v588_v35 = vpop.f32.mrf.mxu1 }
 0x358   : > { %v1573_v36 = vpop.f32.mrf.mxu1 }
 0x3df   : > { %v594_v37 = vpop.xlane.xlu1 %593 }
 0x3e0   : > { %v595_v38 = vsub.f32 %v591_v32, %v594_v37 }
 0x3e2   : > { %v596_v39 = vmul.f32 1.442695, %v595_v38 }
 0x3e4   : > { %1734 = vpow2.f32 %v596_v39 }
 0x3f1   : > { %v1735_v40 = vpop.eup %1734 }
 0x3f2   : > { %v598_v41 = vsel %vm544_vm2, %v1735_v40, 0.0 }
 0x3f3   : > { %599 = vadd.xlane.f32.xlu0 %v598_v41 }
 0x409   : > { %656 = vrot.lane.b32.xlu0 %v1987_v24, %s1822_s21  ;;  %s1760_s21 = sshll.u32 %s1831_s20, 4  ;;  %s1761_s21 = int_to_ptr.vmem [resolvable:$false] %s1760_s21 }
 0x40a   : > { %s1762_s0 = scalar_lea.vmem %s1761_s21, 256 }
 0x40d   : > { %654 = vrot.lane.b32.xlu0 %v1987_v24, %s1823_s22  ;;  %s1518_s22 = sshll.u32 %s1923_s29, 7 }
 0x40e   : > { %s2154_s1 = scalar_lea.hbm %s2209_s13, %s1518_s22 }
 0x47c   : > { %v600_v42 = vpop.xlane.xlu0 %599 }
 0x47d   : > { %1736 = vrcp.f32 %v600_v42 }
 0x480   : > { %v657_v45 = vpop.permute.xlu0 %656 }
 0x481   : > { %v662_v47 = vsel %vm544_vm2, %v657_v45, 0 }
 0x484   : > { %v655_v48 = vpop.permute.xlu0 %654 }
 0x48a   : > { %v1737_v43 = vpop.eup %1736 }
 0x48b   : > { %v602_v44 = vmul.f32 %v1737_v43, %v1735_v40 }
 0x48d   : > { %v603_v46 = vpack.c.bf16 %v602_v44, %v602_v44 }
 0x48f   : > { %1577 = vmatmul.mubr.msk.bf16.vlgmr.msra.gmra.mxu1 %vm544_vm2, %v603_v46 }
 0x490   : > { %1581 = vmatpush3.bf16.xpose.msra.mxu1 %v662_v47  ;;  %1582 = vmatprep.mubr.msk.bf16.mxu1 %vm1819_vm1, %v1818_v8 }
 0x491   : > { %1592 = vmatprep.subr.bf16.mxu1 %v1818_v8 }
 0x497   : > { %1583 = vmatmul.mubr.msk.bf16.vlgmr.msra.gmra.mxu1 %vm544_vm2, %v655_v48 }
 0x498   : > { %1594 = vmatprep.mubr.msk.bf16.mxu1 %vm1819_vm1, %v1818_v8  ;;  %1593 = vmatpush3.bf16.msra.mxu1 %v770_v4 }
 0x499   : > { %1604 = vmatprep.subr.bf16.mxu1 %v1818_v8 }
 0x54f   : > { %v647_v49 = vpop.f32.mrf.mxu1 }
 0x550   : > { %v653_v13 = vpack.c.bf16 %v647_v49, %v647_v49 }
 0x551   : > { %v1578_v50 = vpop.f32.mrf.mxu1 }
 0x552   : > { %v538_v50 = vld [vmem:[%s2201_s5 + $0x8] sm:$0xf] }
 0x553   : > { %v650_v51 = vpop.f32.mrf.mxu1 }
 0x554   : > { %v974_v51 = vsel %vm609_vm3, %v538_v50, 0  ;;  %v1724_v50 = vld [vmem:[%s2207_s11 + $0x38] sm:$0xff]  }
 0x555   : > { %v1579_v52 = vpop.f32.mrf.mxu1 }
 0x557   : > { %v698_v53 = vpop.f32.mrf.mxu1 }
 0x558   : > { %v704_v54 = vmul.f32 0.35355338, %v698_v53 }
 0x559   : > { %v1584_v55 = vpop.f32.mrf.mxu1 }
 0x55a   : > { %v705_v56 = vsel %vm544_vm2, %v704_v54, -inf }
 0x55b   : > { %706 = vmax.xlane.f32.xlu1 %v705_v56  ;;  %v701_v57 = vpop.f32.mrf.mxu1 }
 0x55d   : > { %v1585_v58 = vpop.f32.mrf.mxu1 }
 0x56c   : > { %717 = vrot.lane.b32.xlu1 %v1987_v24, %s1824_s23  ;;  %s1828_s23 = smov 72  }
 0x570   : > { %860 = vrot.lane.b32.xlu1 %v1987_v24, %s1825_s24  ;;  %s1829_s24 = smov 104  }
 0x574   : > { %858 = vrot.lane.b32.xlu1 %v1987_v24, %s1826_s30 }
 0x5e4   : > { %v707_v59 = vpop.xlane.xlu1 %706 }
 0x5e5   : > { %v708_v60 = vsub.f32 %v704_v54, %v707_v59 }
 0x5e7   : > { %v709_v61 = vmul.f32 1.442695, %v708_v60 }
 0x5e8   : > { %v718_v62 = vpop.permute.xlu1 %717 }
 0x5e9   : > { %1738 = vpow2.f32 %v709_v61  ;;  %v723_v63 = vsel %vm609_vm3, %v718_v62, 0 }
 0x5ea   : > { %1587 = vmatpush3.bf16.msra.mxu0 %v723_v63 }
 0x5eb   : > { %1598 = vmatprep.subr.bf16.mxu0 %v1818_v8 }
 0x5ec   : > { %v861_v15 = vpop.permute.xlu1 %860 }
 0x5ed   : > { %v866_v19 = vsel %vm544_vm2, %v861_v15, 0 }
 0x5f0   : > { %v859_v23 = vpop.permute.xlu1 %858 }
 0x5f6   : > { %v1739_v1 = vpop.eup %1738 }
 0x5f7   : > { %v711_v2 = vsel %vm544_vm2, %v1739_v1, 0.0 }
 0x5f8   : > { %712 = vadd.xlane.f32.xlu0 %v711_v2 }
 0x60e   : > { %921 = vrot.lane.b32.xlu0 %v1987_v24, %s1827_s15  ;;  %s429_s15 = sand.u32 1, %s1808_s26  }
 0x60f   : > { %s1404_s29 = scalar_lea.sflag [#allocation3], %s429_s15 }
 0x681   : > { %v713_v5 = vpop.xlane.xlu0 %712 }
 0x682   : > { %1740 = vrcp.f32 %v713_v5 }
 0x685   : > { %v922_v12 = vpop.permute.xlu0 %921 }
 0x686   : > { %v927_v14 = vsel %vm609_vm3, %v922_v12, 0 }
 0x68f   : > { %v1741_v6 = vpop.eup %1740 }
 0x690   : > { %v715_v9 = vmul.f32 %v1741_v6, %v1739_v1 }
 0x692   : > { %v716_v10 = vpack.c.bf16 %v715_v9, %v715_v9 }
 0x694   : > { %1589 = vmatmul.mubr.msk.bf16.vlgmr.msra.gmra.mxu0 %vm544_vm2, %v716_v10 }
 0x695   : > { %1599 = vmatpush3.bf16.msra.mxu0 %v816_v11  ;;  %1600 = vmatprep.mubr.msk.bf16.mxu0 %vm1819_vm1, %v1818_v8  ;;  %v539_v11 = vld [vmem:[%s2201_s5 + $0xc] sm:$0xf] }
 0x696   : > { %1610 = vmatprep.subr.bf16.mxu0 %v1818_v8  ;;  %v1133_v12 = vsel %vm609_vm3, %v539_v11, 0 }
 0x69c   : > { %1601 = vmatmul.mubr.msk.bf16.vlgmr.msra.gmra.mxu0 %vm544_vm2, %v653_v13 }
 0x69d   : > { %1611 = vmatpush3.bf16.msra.mxu0 %v927_v14  ;;  %1612 = vmatprep.mubr.msk.bf16.mxu0 %vm1819_vm1, %v1818_v8 }
 0x69e   : > { %1622 = vmatprep.subr.bf16.mxu0 %v1818_v8 }
 0x754   : > { %v759_v16 = vpop.f32.mrf.mxu0 }
 0x755   : > { %v765_v17 = vpack.c.bf16 %v759_v16, %v759_v16 }
 0x756   : > { %v1590_v18 = vpop.f32.mrf.mxu0 }
 0x757   : > { %1595 = vmatmul.mubr.msk.bf16.vlgmr.msra.gmra.mxu1 %vm544_vm2, %v765_v17 }
 0x758   : > { %1605 = vmatpush3.bf16.xpose.msra.mxu1 %v866_v19  ;;  %v762_v20 = vpop.f32.mrf.mxu0  ;;  %1606 = vmatprep.mubr.msk.bf16.mxu1 %vm1819_vm1, %v1818_v8 }
 0x759   : > { %1616 = vmatprep.subr.bf16.mxu1 %v1818_v8 }
 0x75a   : > { %v1591_v21 = vpop.f32.mrf.mxu0 }
 0x75c   : > { %v2042_v22 = vpop.f32.mrf.mxu0 }
 0x75e   : > { %v1602_v25 = vpop.f32.mrf.mxu0 }
 0x75f   : > { %1607 = vmatmul.mubr.msk.bf16.vlgmr.msra.gmra.mxu1 %vm544_vm2, %v859_v23 }
 0x760   : > { %v855_v26 = vpop.f32.mrf.mxu0  ;;  %1618 = vmatprep.mubr.msk.bf16.mxu1 %vm1819_vm1, %v1818_v8  ;;  %1617 = vmatpush3.bf16.msra.mxu1 %v974_v51  ;;  %v1725_v51 = vld [vmem:[%s2207_s11 + $0x30] sm:$0xff]  }
 0x761   : > { %1628 = vmatprep.subr.bf16.mxu1 %v1818_v8 }
 0x762   : > { %v1603_v27 = vpop.f32.mrf.mxu0 }
 0x763   : > { %v1500_v27 = vld [vmem:[%s2202_s6] ss:$0 sm:$0xff] }
 0x817   : > { %v2047_v28 = vpop.f32.mrf.mxu1 }
 0x818   : > { %v853_v7 = vadd.f32 %v2042_v22, %v2047_v28 }
 0x819   : > { %v1596_v29 = vpop.f32.mrf.mxu1 }
 0x81b   : > { %v809_v30 = vpop.f32.mrf.mxu1 }
 0x81d   : > { %v1597_v31 = vpop.f32.mrf.mxu1 }
 0x81f   : > { %v902_v32 = vpop.f32.mrf.mxu1 }
 0x820   : > { %v908_v33 = vmul.f32 0.35355338, %v902_v32 }
 0x821   : > { %v1608_v34 = vpop.f32.mrf.mxu1 }
 0x822   : > { %v909_v35 = vsel %vm544_vm2, %v908_v33, -inf }
 0x823   : > { %910 = vmax.xlane.f32.xlu1 %v909_v35  ;;  %v905_v36 = vpop.f32.mrf.mxu1 }
 0x825   : > { %v1609_v37 = vpop.f32.mrf.mxu1 }
 0x8ac   : > { %v911_v38 = vpop.xlane.xlu1 %910 }
 0x8ad   : > { %v912_v39 = vsub.f32 %v908_v33, %v911_v38 }
 0x8af   : > { %v913_v40 = vmul.f32 1.442695, %v912_v39  ;;  %v1723_v39 = vld [vmem:[%s2205_s9] sm:$0xff]  }
 0x8b1   : > { %1742 = vpow2.f32 %v913_v40 }
 0x8be   : > { %v1743_v41 = vpop.eup %1742 }
 0x8bf   : > { %v915_v42 = vsel %vm544_vm2, %v1743_v41, 0.0 }
 0x8c0   : > { %916 = vadd.xlane.f32.xlu0 %v915_v42 }
 0x8d6   : > { %1019 = vrot.lane.b32.xlu0 %v1987_v24, %s1828_s23 }
 0x8da   : > { %1017 = vrot.lane.b32.xlu0 %v1987_v24, %s1829_s24 }
 0x949   : > { %v917_v43 = vpop.xlane.xlu0 %916 }
 0x94a   : > { %1744 = vrcp.f32 %v917_v43 }
 0x94d   : > { %v1020_v46 = vpop.permute.xlu0 %1019 }
 0x94e   : > { %v1025_v48 = vsel %vm544_vm2, %v1020_v46, 0  ;;  %v1502_v46 = vld [vmem:[%s2204_s8] ss:$0 sm:$0xff] }
 0x951   : > { %v1018_v49 = vpop.permute.xlu0 %1017 }
 0x957   : > { %v1745_v44 = vpop.eup %1744 }
 0x958   : > { %v919_v45 = vmul.f32 %v1745_v44, %v1743_v41  ;;  %v1501_v44 = vld [vmem:[%s2203_s7] ss:$0 sm:$0xff] }
 0x95a   : > { %v920_v47 = vpack.c.bf16 %v919_v45, %v919_v45 }
 0x95c   : > { %1613 = vmatmul.mubr.msk.bf16.vlgmr.msra.gmra.mxu0 %vm544_vm2, %v920_v47 }
 0x95d   : > { %1623 = vmatpush3.bf16.xpose.msra.mxu0 %v1025_v48  ;;  %1624 = vmatprep.mubr.msk.bf16.mxu0 %vm1819_vm1, %v1818_v8 }
 0x95e   : > { %1634 = vmatprep.subr.bf16.mxu0 %v1818_v8 }
 0x964   : > { %1625 = vmatmul.mubr.msk.bf16.vlgmr.msra.gmra.mxu0 %vm544_vm2, %v1018_v49 }
 0x965   : > { %1636 = vmatprep.mubr.msk.bf16.mxu0 %vm1819_vm1, %v1818_v8  ;;  %1635 = vmatpush3.bf16.msra.mxu0 %v1133_v12 }
 0x966   : > { %1648 = vmatprep.subr.bf16.mxu0 %v1818_v8 }
 0xa1c   : > { %v963_v52 = vpop.f32.mrf.mxu0 }
 0xa1d   : > { %v969_v53 = vpack.c.bf16 %v963_v52, %v963_v52  ;;  %v1726_v52 = vld [vmem:[%s2207_s11 + $0x28] sm:$0xff]  }
 0xa1e   : > { %v1614_v54 = vpop.f32.mrf.mxu0 }
 0xa1f   : > { %1619 = vmatmul.mubr.msk.bf16.vlgmr.msra.gmra.mxu1 %vm544_vm2, %v969_v53  ;;  %v1727_v53 = vld [vmem:[%s2207_s11 + $0x20] sm:$0xff]   ;;  %v1728_v54 = vld [vmem:[%s2207_s11 + $0x18] sm:$0xff]  }
 0xa20   : > { %v966_v55 = vpop.f32.mrf.mxu0  ;;  %1630 = vmatprep.mubr.msk.bf16.mxu1 %vm1819_vm1, %v1818_v8 }
 0xa21   : > { %v1729_v55 = vld [vmem:[%s2207_s11 + $0x10] sm:$0xff]  }
 0xa22   : > { %v1615_v56 = vpop.f32.mrf.mxu0 }
 0xa23   : > { %v1730_v56 = vld [vmem:[%s2207_s11 + $0x8] sm:$0xff]  }
 0xa24   : > { %v1061_v57 = vpop.f32.mrf.mxu0 }
 0xa25   : > { %v1067_v58 = vmul.f32 0.35355338, %v1061_v57  ;;  %v1731_v57 = vld [vmem:[%s2207_s11] sm:$0xff]  }
 0xa26   : > { %v1626_v59 = vpop.f32.mrf.mxu0 }
 0xa27   : > { %v1068_v60 = vsel %vm544_vm2, %v1067_v58, -inf }
 0xa28   : > { %1069 = vmax.xlane.f32.xlu1 %v1068_v60  ;;  %v1064_v61 = vpop.f32.mrf.mxu0 }
 0xa2a   : > { %v1627_v62 = vpop.f32.mrf.mxu0 }
 0xa39   : > { %1080 = vrot.lane.b32.xlu1 %v1987_v24, %s1830_s16  ;;  %s1480_s16 = sshll.u32 %s429_s15, 3 }
 0xa3a   : > { %s431_s23 = scalar_lea.vmem [#allocation2], %s1480_s16 }
 0xa3b   : > { %s1417_s24 = sshll.u32 %s431_s23, 4  ;;  %s2156_s24 = int_to_ptr.vmem [resolvable:$true] %s1417_s24 }
 0xa3c   : > { %s1756_s16 = scalar_lea.vmem %s2156_s24, 128  ;;  %p1763_p0 = scmp.lt.s32.totalorder %s2156_s24, %s1761_s21 }
 0xa3d   : > { %p1757_p11 = scmp.ne.s32.totalorder %s2156_s24, %s1756_s16  ;;  %p1764_p1 = scmp.lt.s32.totalorder %s1762_s0, %s1756_s16 }
 0xa3f   : > { %p1758_p12 = pnand %p1757_p11, %p1940_p5  ;;  %p1765_p2 = por %p1764_p1, %p1763_p0 }
 0xa41   : > { %p1759_p13 = pneg %p1758_p12 }
 0xa43   : > { %p1766_p3 = pnand %p1765_p2, %p1759_p13 }
 0xab1   : > { %v1070_v63 = vpop.xlane.xlu1 %1069 }
 0xab2   : > { %v1071_v1 = vsub.f32 %v1067_v58, %v1070_v63  ;;  %v1503_v58 = vld [vmem:[%s2206_s10] ss:$0 sm:$0xff] }
 0xab4   : > { %v1072_v2 = vmul.f32 1.442695, %v1071_v1 }
 0xab5   : > { %v1081_v3 = vpop.permute.xlu1 %1080 }
 0xab6   : > { %1746 = vpow2.f32 %v1072_v2  ;;  %v1086_v4 = vsel %vm609_vm3, %v1081_v3, 0 }
 0xab7   : > { %1629 = vmatpush3.bf16.msra.mxu1 %v1086_v4 }
 0xab8   : > { %1640 = vmatprep.subr.bf16.mxu1 %v1818_v8 }
 0xac3   : > { %v1747_v5 = vpop.eup %1746 }
 0xac4   : > { %v1074_v6 = vsel %vm544_vm2, %v1747_v5, 0.0 }
 0xac5   : > { %1075 = vadd.xlane.f32.xlu0 %v1074_v6 }
 0xadf   : > { %v1010_v9 = vpop.f32.mrf.mxu1 }
 0xae0   : > { %v1016_v10 = vadd.f32 %v1010_v9, %v853_v7  ;;  %v1508_v7 = vld [vmem:[%s2208_s12] ss:$0 sm:$0xff] }
 0xae1   : > { %v1620_v24 = vpop.f32.mrf.mxu1 }
 0xae3   : > { %v1013_v13 = vpop.f32.mrf.mxu1 }
 0xae5   : > { %v1621_v14 = vpop.f32.mrf.mxu1 }
 0xb4e   : > { %v1076_v15 = vpop.xlane.xlu0 %1075 }
 0xb4f   : > { %1748 = vrcp.f32 %v1076_v15 }
 0xb5c   : > { %v1749_v16 = vpop.eup %1748 }
 0xb5d   : > { %v1078_v17 = vmul.f32 %v1749_v16, %v1747_v5 }
 0xb5f   : > { %v1079_v18 = vpack.c.bf16 %v1078_v17, %v1078_v17 }
 0xb61   : > { %1631 = vmatmul.mubr.msk.bf16.vlgmr.msra.gmra.mxu1 %vm544_vm2, %v1079_v18 }
 0xb62   : > { %1644 = vmatprep.mubr.msk.bf16.mxu1 %vm1819_vm1, %v1818_v8 }
 0xc21   : > { %v1122_v19 = vpop.f32.mrf.mxu1 }
 0xc22   : > { %v1128_v20 = vpack.c.bf16 %v1122_v19, %v1122_v19 }
 0xc23   : > { %v1632_v21 = vpop.f32.mrf.mxu1 }
 0xc24   : > { %1637 = vmatmul.mubr.msk.bf16.vlgmr.msra.gmra.mxu0 %vm544_vm2, %v1128_v20 }
 0xc25   : > { %v1125_v22 = vpop.f32.mrf.mxu1  ;;  %1664 = vmatprep.mubr.msk.bf16.mxu0 %vm1819_vm1, %v1818_v8  ;;  %1649 = vmatpush3.bf16.msra.mxu0 %v1724_v50 }
 0xc26   : > { %1650 = vmatprep.subr.bf16.mxu0 %v1818_v8 }
 0xc27   : > { %v1633_v23 = vpop.f32.mrf.mxu1 }
 0xc29   : > { %1651 = vmatpush3.bf16.msra.mxu0 %v1725_v51 }
 0xc2a   : > { %1652 = vmatprep.subr.bf16.mxu0 %v1818_v8 }
 0xc2d   : > { %1653 = vmatpush3.bf16.msra.mxu0 %v1726_v52 }
 0xc2e   : > { %1654 = vmatprep.subr.bf16.mxu0 %v1818_v8 }
 0xc31   : > { %1655 = vmatpush3.bf16.msra.mxu0 %v1727_v53 }
 0xc32   : > { %1656 = vmatprep.subr.bf16.mxu0 %v1818_v8 }
 0xc35   : > { %1657 = vmatpush3.bf16.msra.mxu0 %v1728_v54 }
 0xc36   : > { %1658 = vmatprep.subr.bf16.mxu0 %v1818_v8 }
 0xc39   : > { %1659 = vmatpush3.bf16.msra.mxu0 %v1729_v55 }
 0xc3a   : > { %1660 = vmatprep.subr.bf16.mxu0 %v1818_v8 }
 0xc3d   : > { %1661 = vmatpush3.bf16.msra.mxu0 %v1730_v56 }
 0xc3e   : > { %1662 = vmatprep.subr.bf16.mxu0 %v1818_v8 }
 0xc41   : > { %1663 = vmatpush3.bf16.msra.mxu0 %v1731_v57 }
 0xce4   : > { %v1169_v25 = vpop.f32.mrf.mxu0 }
 0xce5   : > { %v1175_v26 = vadd.f32 %v1169_v25, %v1016_v10 }
 0xce6   : > { %v1638_v28 = vpop.f32.mrf.mxu0 }
 0xce7   : > { %v1176_v29 = vadd.f32 %v1175_v26, %v1955_v0  ;;  %v1722_v0 = vld [vmem:[%s2205_s9 + $0x8] sm:$0xff]  }
 0xce8   : > { %v1172_v30 = vpop.f32.mrf.mxu0  ;;  %1641 = vmatpush3.bf16.msra.mxu1 %v1722_v0 }
 0xce9   : > { %v2091_v31 = vadd.f32 %v1500_v27, %v1176_v29  ;;  %1642 = vmatprep.subr.bf16.mxu1 %v1818_v8 }
 0xcea   : > { %v1639_v32 = vpop.f32.mrf.mxu0 }
 0xceb   : > { %v1187_v33 = vsel %vm440_vm0, %v2091_v31, 0.0 }
 0xcec   : > { %1188 = vadd.xlane.f32.xlu1 %v1187_v33  ;;  %1643 = vmatpush3.bf16.msra.mxu1 %v1723_v39 }
 0xd75   : > { %v1189_v34 = vpop.xlane.xlu1 %1188 }
 0xd76   : > { %v1190_v35 = vmul.f32 0.03125, %v1189_v34 }
 0xd78   : > { %v1191_v36 = vsub.f32 %v2091_v31, %v1190_v35 }
 0xd7a   : > { %v1192_v37 = vmul.f32 %v1191_v36, %v1191_v36 }
 0xd7c   : > { %v1193_v38 = vsel %vm440_vm0, %v1192_v37, 0.0 }
 0xd7d   : > { %1194 = vadd.xlane.f32.xlu0 %v1193_v38 }
 0xe06   : > { %v1195_v40 = vpop.xlane.xlu0 %1194 }
 0xe07   : > { %v1196_v41 = vmul.f32 0.03125, %v1195_v40 }
 0xe09   : > { %v1197_v42 = vadd.f32 1e-05, %v1196_v41 }
 0xe0b   : > { %1750 = vrsqrt.f32 %v1197_v42 }
 0xe18   : > { %v1751_v43 = vpop.eup %1750 }
 0xe19   : > { %v1199_v45 = vmul.f32 %v1751_v43, %v1191_v36 }
 0xe1b   : > { %v1206_v47 = vmul.f32 %v1501_v44, %v1199_v45 }
 0xe1d   : > { %v1213_v48 = vadd.f32 %v1502_v46, %v1206_v47 }
 0xe1f   : > { %v1214_v49 = vpack.c.bf16 %v1213_v48, %v1213_v48 }
 0xe21   : > { %1645 = vmatmul.mubr.msk.bf16.vlgmr.msra.gmra.mxu1 %vm440_vm0, %v1214_v49 }
 0xee1   : > { %v1275_v59 = vpop.f32.mrf.mxu1 }
 0xee2   : > { %v1276_v60 = vadd.f32 %v1503_v58, %v1275_v59 }
 0xee3   : > { %v1646_v61 = vpop.f32.mrf.mxu1 }
 0xee4   : > { %v1507_v62 = vmul.f32 -1.702, %v1276_v60 }
 0xee5   : > { %v1278_v63 = vpop.f32.mrf.mxu1 }
 0xee6   : > { %v1283_v1 = vmul.f32 1.442695, %v1507_v62 }
 0xee7   : > { %v1647_v2 = vpop.f32.mrf.mxu1 }
 0xee8   : > { %1752 = vpow2.f32 %v1283_v1 }
 0xef5   : > { %v1753_v8 = vpop.eup %1752 }
 0xef6   : > { %v1285_v3 = vadd.f32 1.0, %v1753_v8 }
 0xef8   : > { %1754 = vrcp.f32 %v1285_v3 }
 0xf05   : > { %v1755_v4 = vpop.eup %1754 }
 0xf06   : > { %v1288_v5 = vmul.f32 %v1755_v4, %v1276_v60 }
 0xf08   : > { %v1289_v6 = vpack.c.bf16 %v1288_v5, %v1288_v5 }
 0xf0a   : > { %1665 = vmatmul.mubr.bf16.vlgmr.msra.gmra.mxu0 %v1289_v6 }
 0xfca   : > { %v1395_v9 = vpop.f32.mrf.mxu0 }
 0xfcb   : > { %v1396_v10 = vadd.f32 %v1508_v7, %v1395_v9 }
 0xfcc   : > { %v1666_v24 = vpop.f32.mrf.mxu0 }
 0xfcd   : > { %v1401_v11 = vadd.f32 %v1396_v10, %v2091_v31 }
 0xfce   : > { %v1398_v12 = vpop.f32.mrf.mxu0 }
 0xfcf   : > { %1402 = vst.msk [vmem:[%s431_s23] sm:$0xff] %vm440_vm0, %v1401_v11 }
 0xfd0   : > { %v1667_v13 = vpop.f32.mrf.mxu0 }
 0xfd1   : > { %1769 = shalt.err (!%p1766_p3)
}
 0xfd2   : > { %s1770_s22 = scalar_lea.hbm %s2154_s1, 128  ;;  %s1774_s30 = scalar_lea.hbm %s2209_s13, 256 }
 0xfd3   : > { %p1771_p4 = scmp.ne.s32.totalorder %s2154_s1, %s1770_s22  ;;  %p1775_p9 = scmp.lt.s32.totalorder %s2154_s1, %s2209_s13 }
 0xfd4   : > { %p1776_p10 = scmp.lt.s32.totalorder %s1774_s30, %s1770_s22 }
 0xfd5   : > { %p1772_p7 = pnand %p1771_p4, %p1940_p5 }
 0xfd6   : > { %p1777_p11 = por %p1776_p10, %p1775_p9 }
 0xfd7   : > { %p1773_p8 = pneg %p1772_p7 }
 0xfd9   : > { %p1778_p12 = pnand %p1777_p11, %p1773_p8 }
 0xfdb   : > { %1781 = shalt.err (!%p1778_p12)
}
 0xfdc   : > { %1668 = dma.vmem_to_hbm [thread:$0]  (%p1940_p5), %s2156_s24, 128, %s2154_s1, %s1404_s29  }
 0xfdd PF: > { %p1674_p13 = scmp.ge.s32.totalorder %s1816_s28, 2  ;;  %s1429_s16 = sand.u32 1, %s1804_s25  }
 0xfde   : > { %s1430_s2 = scalar_lea.sflag [#allocation3], %s1429_s16 }
 0xfdf   : > { %p1671_p0 = pnand %p1674_p13, %p1944_p6 }
 0xfe1   : > { %p1672_p1 = pneg %p1671_p0 }
 0xfe3   : > { %1799 = dma.done.wait (%p1672_p1), %s1430_s2, 128  }
 0xfe4   : > { %1801 = vsyncadd (%p1672_p1), %s1430_s2, 4294967168  ;;  %p23_p2 = scmp.ge.s32.totalorder %s1927_s14, 4   ;;  %s2218_s25 = smov %s1808_s26 }
 0xfe5   : > { %s2219_s26 = smov %s1812_s27  ;;  %s2220_s27 = smov %s1938_s17 }
 0xfe6   : > { %s2221_s28 = smov %s1927_s14  ;;  %25 = sbr.rel (!%p23_p2) target bundleno = 7 (0x7), region = 107 }
 0xfeb   :  { %1435 = vsyncpa [#allocation3], 1 }
 0xfec   :  { %1437 = vsyncpa [#allocation3 + $0x1], 1 }

</bundles_post_ra>
